<compile_context>
chip_gen: v7x
topology: tpu7x:2x2x1
jax: 0.10.0
libtpu: 0.0.40
codegen_flags: <defaults>
</compile_context>

<pallas_src>
import jax
import jax.numpy as jnp
from jax import lax
from jax.experimental import pallas as pl
from jax.experimental.pallas import tpu as pltpu


def _round_up(x, m):
    return ((x + m - 1) // m) * m


def center_loss_kernel(xs_ref, ys_ref, w_ref, center_ref, out_ref):
    # xs_ref:     (tm, Fp)  feature rows (zero-padded rows/lanes)
    # ys_ref:     (tm, 1)   int32 labels (padded rows hold 0)
    # w_ref:      (tm, 1)   f32, 1/count[y] (padded rows hold 0 -> contribute nothing)
    # center_ref: (Cp, Fp)  class centers, VMEM-resident (zero-padded rows/lanes)
    # out_ref:    (1, 8, 128) f32, per-tile partial sum at [0, 0, 0]
    tm = xs_ref.shape[0]
    cp = center_ref.shape[0]

    xs = xs_ref[...].astype(jnp.float32)            # (tm, Fp)
    ys = ys_ref[...]                                # (tm, 1) int32
    w = w_ref[...].astype(jnp.float32)              # (tm, 1)
    center = center_ref[...].astype(jnp.float32)    # (Cp, Fp)

    # L2 normalize (torch F.normalize, eps=1e-12): x * rsqrt(max(||x||^2, eps^2)).
    ss = jnp.sum(xs * xs, axis=1, keepdims=True)    # (tm, 1)
    xs_n = xs * lax.rsqrt(jnp.maximum(ss, 1e-24))

    # Gather center[ys] for the whole tile via a one-hot matmul on the otherwise-idle
    # MXU.  HIGHEST precision keeps the f32 center rows exact (a single bf16 pass
    # would round them and break tight tolerances).
    class_iota = lax.broadcasted_iota(jnp.int32, (tm, cp), 1)
    onehot = (ys == class_iota).astype(jnp.float32)                 # (tm, Cp)
    center_exp = jnp.dot(onehot, center,
                         preferred_element_type=jnp.float32,
                         precision=lax.Precision.HIGHEST)           # (tm, Fp)

    diff = xs_n - center_exp
    d2 = jnp.sum(diff * diff, axis=1, keepdims=True)                # (tm, 1)
    dist = jnp.sqrt(d2)
    tile_sum = jnp.sum(dist * w)     # scalar; padded rows have w == 0

    # Lane-dense store: one full (8,128) vreg, partial sum in [0,0], zeros elsewhere.
    sub = lax.broadcasted_iota(jnp.int32, (1, 8, 128), 1)
    lane = lax.broadcasted_iota(jnp.int32, (1, 8, 128), 2)
    out_ref[...] = jnp.where((sub == 0) & (lane == 0), tile_sum, 0.0)


def center_loss(xs, ys, center, *, tm=512):
    """xs: (N, F), ys: (N,) int labels in [0, C), center: (C, F)."""
    N, F = xs.shape
    C, _ = center.shape
    ys_i = ys.astype(jnp.int32)

    # Whole-batch histogram (torch.histc) hoisted to the wrapper (tiny scatter-add);
    # per-row weight 1/count[y] is gathered here so the kernel only multiplies.
    counts = jnp.zeros((C,), jnp.float32).at[ys_i].add(1.0)
    w = (1.0 / counts)[ys_i]         # (N,); only occurring classes are ever indexed

    Fp = _round_up(F, 128)           # full-lane vregs, unmasked vld/vst
    Cp = _round_up(C, 128)           # full MXU contraction width for the one-hot gather

    tm_eff = _round_up(min(tm, _round_up(N, 8)), 8)
    T = pl.cdiv(N, tm_eff)
    N_pad = T * tm_eff

    xs_p = jnp.zeros((N_pad, Fp), xs.dtype).at[:N, :F].set(xs)
    center_p = jnp.zeros((Cp, Fp), center.dtype).at[:C, :F].set(center)
    ys_p = jnp.zeros((N_pad, 1), jnp.int32).at[:N, 0].set(ys_i)
    w_p = jnp.zeros((N_pad, 1), jnp.float32).at[:N, 0].set(w.astype(jnp.float32))

    grid_spec = pl.GridSpec(
        grid=(T,),
        in_specs=[
            pl.BlockSpec((tm_eff, Fp), lambda t: (t, 0)),   # xs tile
            pl.BlockSpec((tm_eff, 1), lambda t: (t, 0)),    # labels
            pl.BlockSpec((tm_eff, 1), lambda t: (t, 0)),    # 1/count[y]
            pl.BlockSpec((Cp, Fp), lambda t: (0, 0)),       # center, resident in VMEM
        ],
        out_specs=pl.BlockSpec((1, 8, 128), lambda t: (t, 0, 0)),
    )

    partials = pl.pallas_call(
        center_loss_kernel,
        out_shape=jax.ShapeDtypeStruct((T, 8, 128), jnp.float32),
        grid_spec=grid_spec,
        compiler_params=pltpu.CompilerParams(
            # Tiles are fully independent (each writes its own output block) ->
            # "parallel" lets megacore/v7x shard the row-tile axis across TCs.
            dimension_semantics=("parallel",),
            # Double-buffered (tm, Fp) tile + resident (Cp, Fp) center fit easily;
            # 32 MiB is safe on v5e/v6e (128 MiB physical) and v7x (64 MiB physical).
            vmem_limit_bytes=32 * 1024 * 1024,
        ),
    )(xs_p, ys_p, w_p, center_p)

    return jnp.sum(partials)


def center_loss_ref(xs, ys, center):
    """Pure-JAX reference mirroring the PyTorch forward."""
    norm = jnp.sqrt(jnp.sum(xs * xs, axis=1, keepdims=True))
    xs_n = xs / jnp.maximum(norm, 1e-12)
    center_exp = center[ys]
    counts = jnp.sum(ys[:, None] == jnp.arange(center.shape[0])[None, :],
                     axis=0).astype(jnp.float32)
    count_dis = counts[ys]
    dist = jnp.sqrt(jnp.sum((xs_n - center_exp) ** 2, axis=1))
    return jnp.sum(dist / count_dis)


if __name__ == "__main__":
    key = jax.random.PRNGKey(0)
    k_center, k_xs, k_ys, k2_xs, k2_ys = jax.random.split(key, 5)

    # Small shapes consistent with the module (cls_num=4, feature_num=32, batch=8).
    cls_num, feature_num, batch = 4, 32, 8
    center = jax.random.normal(k_center, (cls_num, feature_num), dtype=jnp.float32)
    xs = jax.random.normal(k_xs, (batch, feature_num), dtype=jnp.float32)
    ys = jax.random.randint(k_ys, (batch,), 0, cls_num, dtype=jnp.int32)

    loss = center_loss(xs, ys, center)
    jax.block_until_ready(loss)
    ref = center_loss_ref(xs, ys, center)
    assert jnp.allclose(loss, ref, rtol=1e-5, atol=1e-5), (loss, ref)

    # Second check: multi-tile grid + row padding path (N=37 with tm=16 -> 3 tiles).
    xs2 = jax.random.normal(k2_xs, (37, feature_num), dtype=jnp.float32)
    ys2 = jax.random.randint(k2_ys, (37,), 0, cls_num, dtype=jnp.int32)
    loss2 = center_loss(xs2, ys2, center, tm=16)
    jax.block_until_ready(loss2)
    ref2 = center_loss_ref(xs2, ys2, center)
    assert jnp.allclose(loss2, ref2, rtol=1e-5, atol=1e-5), (loss2, ref2)

    print("KERNEL_OK")
</pallas_src>

<mosaic_0001>
module attributes {stable_mosaic.version = 11 : i64} {
  func.func @center_loss_kernel(%arg0: i32, %arg1: memref<8x128xf32, #tpu.memory_space<vmem>>, %arg2: memref<8x1xi32, #tpu.memory_space<vmem>>, %arg3: memref<8x1xf32, #tpu.memory_space<vmem>>, %arg4: memref<128x128xf32, #tpu.memory_space<vmem>>, %arg5: memref<1x8x128xf32, #tpu.memory_space<vmem>>) attributes {dimension_semantics = [#tpu.dimension_semantics<parallel>], iteration_bounds = array<i64: 1>, scalar_prefetch = 0 : i64, scratch_operands = 0 : i64, tpu.core_type = #tpu.core_type<tc>, window_params = [{transform_indices = @transform_0, window_bounds = array<i64: 8, 128>}, {transform_indices = @transform_1, window_bounds = array<i64: 8, 1>}, {transform_indices = @transform_2, window_bounds = array<i64: 8, 1>}, {pipeline_mode = #tpu.pipeline_mode<synchronous>, transform_indices = @transform_3, window_bounds = array<i64: 128, 128>}, {transform_indices = @transform_4, window_bounds = array<i64: 1, 8, 128>}]} {
    %c0 = arith.constant 0 : index
    %c0_0 = arith.constant 0 : index
    %0 = vector.load %arg1[%c0, %c0_0] : memref<8x128xf32, #tpu.memory_space<vmem>>, vector<8x128xf32>
    %c0_1 = arith.constant 0 : index
    %c0_2 = arith.constant 0 : index
    %1 = vector.load %arg2[%c0_1, %c0_2] : memref<8x1xi32, #tpu.memory_space<vmem>>, vector<8x1xi32>
    %c0_3 = arith.constant 0 : index
    %c0_4 = arith.constant 0 : index
    %2 = vector.load %arg3[%c0_3, %c0_4] : memref<8x1xf32, #tpu.memory_space<vmem>>, vector<8x1xf32>
    %c0_5 = arith.constant 0 : index
    %c0_6 = arith.constant 0 : index
    %3 = vector.load %arg4[%c0_5, %c0_6] : memref<128x128xf32, #tpu.memory_space<vmem>>, vector<128x128xf32>
    %4 = arith.mulf %0, %0 : vector<8x128xf32>
    %cst = arith.constant dense<0.000000e+00> : vector<8xf32>
    %5 = vector.multi_reduction <add>, %4, %cst [1] : vector<8x128xf32> to vector<8xf32>
    %6 = vector.shape_cast %5 : vector<8xf32> to vector<8x1xf32>
    %cst_7 = arith.constant 1.000000e-24 : f32
    %7 = vector.broadcast %cst_7 : f32 to vector<8x1xf32>
    %8 = arith.maximumf %6, %7 : vector<8x1xf32>
    %9 = math.rsqrt %8 : vector<8x1xf32>
    %10 = vector.broadcast %9 : vector<8x1xf32> to vector<8x128xf32>
    %11 = arith.mulf %0, %10 : vector<8x128xf32>
    %12 = tpu.iota {dimensions = array<i32: 1>} : vector<8x128xi32>
    %13 = vector.broadcast %1 : vector<8x1xi32> to vector<8x128xi32>
    %14 = arith.cmpi eq, %13, %12 : vector<8x128xi32>
    %15 = arith.extui %14 : vector<8x128xi1> to vector<8x128xi32>
    %16 = arith.sitofp %15 : vector<8x128xi32> to vector<8x128xf32>
    %cst_8 = arith.constant dense<0.000000e+00> : vector<8x128xf32>
    %17 = tpu.matmul %16, %3, %cst_8 {dimension_numbers = #tpu.dot_dimension_numbers<[1], [0], [0], [1], [0, 0, 1, 1], [], []>, precision = #tpu.contract_precision<fp32>} : vector<8x128xf32>, vector<128x128xf32>, vector<8x128xf32> -> vector<8x128xf32>
    %18 = arith.subf %11, %17 : vector<8x128xf32>
    %19 = arith.mulf %18, %18 : vector<8x128xf32>
    %cst_9 = arith.constant dense<0.000000e+00> : vector<8xf32>
    %20 = vector.multi_reduction <add>, %19, %cst_9 [1] : vector<8x128xf32> to vector<8xf32>
    %21 = vector.shape_cast %20 : vector<8xf32> to vector<8x1xf32>
    %22 = math.sqrt %21 : vector<8x1xf32>
    %23 = arith.mulf %22, %2 : vector<8x1xf32>
    %24 = vector.shape_cast %23 : vector<8x1xf32> to vector<1x8x1xf32>
    %cst_10 = arith.constant dense<0.000000e+00> : vector<1xf32>
    %25 = vector.multi_reduction <add>, %24, %cst_10 [1, 2] : vector<1x8x1xf32> to vector<1xf32>
    %26 = vector.shape_cast %25 : vector<1xf32> to vector<1x1x1xf32>
    %27 = vector.extract %26[0, 0, 0] : f32 from vector<1x1x1xf32>
    %28 = tpu.iota {dimensions = array<i32: 1>} : vector<1x8x128xi32>
    %29 = tpu.iota {dimensions = array<i32: 2>} : vector<1x8x128xi32>
    %c0_i32 = arith.constant 0 : i32
    %30 = vector.broadcast %c0_i32 : i32 to vector<1x8x128xi32>
    %31 = arith.cmpi eq, %28, %30 : vector<1x8x128xi32>
    %c0_i32_11 = arith.constant 0 : i32
    %32 = vector.broadcast %c0_i32_11 : i32 to vector<1x8x128xi32>
    %33 = arith.cmpi eq, %29, %32 : vector<1x8x128xi32>
    %34 = arith.andi %31, %33 : vector<1x8x128xi1>
    %cst_12 = arith.constant 0.000000e+00 : f32
    %35 = vector.broadcast %27 : f32 to vector<1x8x128xf32>
    %36 = vector.broadcast %cst_12 : f32 to vector<1x8x128xf32>
    %37 = arith.select %34, %35, %36 : vector<1x8x128xi1>, vector<1x8x128xf32>
    %c0_13 = arith.constant 0 : index
    %c0_14 = arith.constant 0 : index
    %c0_15 = arith.constant 0 : index
    %38 = vector.load %arg5[%c0_13, %c0_14, %c0_15] : memref<1x8x128xf32, #tpu.memory_space<vmem>>, vector<1x8x128xf32>
    tpu.vector_store %arg5[%c0_13, %c0_14, %c0_15], %37 {strides = array<i32>} : memref<1x8x128xf32, #tpu.memory_space<vmem>>, vector<1x8x128xf32>,
    return
  }
  func.func @transform_0(%arg0: i32) -> (i32, i32) {
    %c0_i32 = arith.constant 0 : i32
    %c0_i32_0 = arith.constant 0 : i32
    return %arg0, %c0_i32 : i32, i32
  }
  func.func @transform_1(%arg0: i32) -> (i32, i32) {
    %c0_i32 = arith.constant 0 : i32
    %c0_i32_0 = arith.constant 0 : i32
    return %arg0, %c0_i32 : i32, i32
  }
  func.func @transform_2(%arg0: i32) -> (i32, i32) {
    %c0_i32 = arith.constant 0 : i32
    %c0_i32_0 = arith.constant 0 : i32
    return %arg0, %c0_i32 : i32, i32
  }
  func.func @transform_3(%arg0: i32) -> (i32, i32) {
    %c0_i32 = arith.constant 0 : i32
    %c0_i32_0 = arith.constant 0 : i32
    %c0_i32_1 = arith.constant 0 : i32
    return %c0_i32, %c0_i32_0 : i32, i32
  }
  func.func @transform_4(%arg0: i32) -> (i32, i32, i32) {
    %c0_i32 = arith.constant 0 : i32
    %c0_i32_0 = arith.constant 0 : i32
    %c0_i32_1 = arith.constant 0 : i32
    return %arg0, %c0_i32, %c0_i32_0 : i32, i32, i32
  }
}

</mosaic_0001>

<bundles_post_ra>
// kernel: tpu_custom_call.1
= control target key start
LH: loop header
LB: loop body
LE: loop exit
PB: predicated region body
PF: predicated region fallthrough
CT: control target
= control target key end

     0   :  { %9 = vsyncpa [#allocation3], 0  ;;  %s1677_s0 = inlined_call_operand.vmem [shape: f32[8,128], index: 0, kind: input, shape index: {}]   ;;  %s1678_s1 = inlined_call_operand.vmem [shape: s32[8,1], index: 1, kind: input, shape index: {}]   ;;  %s1679_s2 = inlined_call_operand.vmem [shape: f32[8,1], index: 2, kind: input, shape index: {}]   ;;  %s1680_s3 = inlined_call_operand.hbm [shape: f32[128,128], index: 3, kind: input, shape index: {}]   ;;  %s1681_s4 = inlined_call_operand.hbm [shape: f32[1,8,128], index: 4, kind: output, shape index: {}]  }
   0x1   :  { %10 = vsyncpa [#allocation4], 0  ;;  %s1285_s15 = smov [#allocation2]   ;;  %s1237_s19 = scalar_lea.hbm %s1680_s3, 2048 }
   0x2   :  { %s22_s16 = sshll.u32 %s1285_s15, 4  ;;  %p1238_p0 = scmp.ne.s32.totalorder %s1680_s3, %s1237_s19  ;;  %s23_s16 = int_to_ptr.vmem [resolvable:$true] %s22_s16 }
   0x3   :  { %p1241_p1 = scmp.lt.u32.totalorder %s1237_s19, %s1680_s3 }
   0x5   :  { %p1243_p2 = pnand %p1241_p1, %p1238_p0 }
   0x7   :  { %1246 = shalt.err (!%p1243_p2)
}
   0x8   :  { %s1247_s24 = scalar_lea.vmem %s23_s16, 2048  ;;  %p1252_p4 = scmp.lt.s32.totalorder %s23_s16, %s23_s16 }
   0x9   :  { %p1248_p3 = scmp.ne.s32.totalorder %s23_s16, %s1247_s24  ;;  %p1253_p5 = scmp.lt.s32.totalorder %s1247_s24, %s1247_s24 }
   0xb   :  { %p1254_p6 = por %p1253_p5, %p1252_p4 }
   0xd   :  { %p1255_p7 = pnand %p1254_p6, %p1248_p3 }
   0xf   :  { %1258 = shalt.err (!%p1255_p7)
}
  0x10   :  { %s1286_s25 = smov 128   ;;  %s1287_s26 = smov 8  }
  0x11   :  { %28 = dma.hbm_to_vmem [thread:$0]  %s1680_s3, 2048, %s23_s16, [#allocation3], %s1286_s25, %s1286_s25, %s1287_s26  }
  0x12   :  { %1281 = dma.done.wait [#allocation3], 2048  }
  0x13   :  { %1282 = vsyncadd [#allocation3], 4294965248  ;;  %v1288_v0 = vmov 0   ;;  %v1289_v1 = vmov 0.0|0.0   ;;  %v33_v2 = vld [vmem:[%s1678_s1] sm:$0xff]  ;;  %v36_v4 = vld [vmem:[#allocation2 + $0x8] sm:$0xff] }
  0x14   :  { %1232 = vset.pattern.permute.xlu0 %v1288_v0  ;;  %1140 = vmatprep.subr.bf16.mxu0 %v1289_v1  ;;  %v35_v3 = vld [vmem:[#allocation2] sm:$0xff]  ;;  %v69_v6 = vand.u32 4294901760, %v36_v4  ;;  %v37_v7 = vld [vmem:[#allocation2 + $0x10] sm:$0xff]  ;;  %v38_v8 = vld [vmem:[#allocation2 + $0x18] sm:$0xff]  ;;  %vm1290_vm0 = vmmov 0   ;;  %v1291_v53 = vmov 0.0  }
  0x15   :  { %1068 = vmatprep.subr.bf16.mxu1 %v1289_v1  ;;  %60 = vperm.xlu0 %1232, %v33_v2   ;;  %v66_v5 = vand.u32 4294901760, %v35_v3  ;;  %v39_v9 = vld [vmem:[#allocation2 + $0x20] sm:$0xff]  ;;  %v72_v10 = vand.u32 4294901760, %v37_v7  ;;  %v75_v11 = vand.u32 4294901760, %v38_v8  ;;  %v40_v12 = vld [vmem:[#allocation2 + $0x28] sm:$0xff]  ;;  %v41_v14 = vld [vmem:[#allocation2 + $0x30] sm:$0xff] }
  0x16   :  { %v78_v13 = vand.u32 4294901760, %v39_v9  ;;  %v42_v15 = vld [vmem:[#allocation2 + $0x38] sm:$0xff]  ;;  %v1340_v18 = vsub.f32 %v36_v4, %v69_v6  ;;  %v81_v19 = vand.u32 4294901760, %v40_v12  ;;  %v1342_v20 = vld [vmem:[#allocation2 + $0x40] sm:$0xff]  ;;  %v1344_v21 = vld [vmem:[#allocation2 + $0x48] sm:$0xff]  ;;  %v84_v30 = vand.u32 4294901760, %v41_v14  ;;  %995 = vmatprep.mubr.msk.f32.mxu0 %vm1290_vm0, %v1291_v53  ;;  %890 = vmatprep.mubr.msk.f32.mxu1 %vm1290_vm0, %v1291_v53 }
  0x17   :  { %v1336_v16 = vpack.c.bf16 %v69_v6, %v66_v5  ;;  %v1338_v17 = vsub.f32 %v35_v3, %v66_v5  ;;  %v1346_v22 = vld [vmem:[#allocation2 + $0x50] sm:$0xff]  ;;  %v1348_v23 = vsub.f32 %v37_v7, %v72_v10  ;;  %v1350_v24 = vsub.f32 %v38_v8, %v75_v11  ;;  %v1354_v26 = vld [vmem:[#allocation2 + $0x58] sm:$0xff]  ;;  %v1356_v27 = vld [vmem:[#allocation2 + $0x60] sm:$0xff] }
  0x18   :  { %v1352_v25 = vsub.f32 %v39_v9, %v78_v13  ;;  %v1360_v28 = vpack.c.bf16 %v75_v11, %v72_v10  ;;  %v1362_v29 = vsub.f32 %v40_v12, %v81_v19  ;;  %v87_v31 = vand.u32 4294901760, %v42_v15  ;;  %v1369_v35 = vld [vmem:[#allocation2 + $0x68] sm:$0xff]  ;;  %v1377_v40 = vld [vmem:[#allocation2 + $0x70] sm:$0xff]  ;;  %v1379_v41 = vld [vmem:[#allocation2 + $0x78] sm:$0xff] }
  0x19   :  { %1142 = vmatpush3.bf16.msra.mxu0 %v1336_v16  ;;  %1070 = vmatpush3.bf16.msra.mxu1 %v1336_v16  ;;  %v90_v32 = vand.u32 4294901760, %v1342_v20  ;;  %v93_v33 = vand.u32 4294901760, %v1344_v21  ;;  %v96_v34 = vand.u32 4294901760, %v1346_v22  ;;  %v1371_v36 = vsub.f32 %v41_v14, %v84_v30 }
  0x1a   :  { %1143 = vmatprep.subr.bf16.mxu0 %v1289_v1  ;;  %1071 = vmatprep.subr.bf16.mxu1 %v1289_v1  ;;  %v1373_v37 = vsub.f32 %v42_v15, %v87_v31  ;;  %v99_v38 = vand.u32 4294901760, %v1354_v26  ;;  %v102_v39 = vand.u32 4294901760, %v1356_v27  ;;  %v1381_v42 = vpack.c.bf16 %v81_v19, %v78_v13 }
  0x1b   :  { %v1384_v43 = vsub.f32 %v1342_v20, %v90_v32  ;;  %v1387_v44 = vsub.f32 %v1344_v21, %v93_v33  ;;  %v1394_v45 = vsub.f32 %v1346_v22, %v96_v34  ;;  %v105_v47 = vand.u32 4294901760, %v1369_v35 }
  0x1c   :  { %v1399_v46 = vsub.f32 %v1354_v26, %v99_v38  ;;  %v1405_v48 = vsub.f32 %v1356_v27, %v102_v39  ;;  %v108_v49 = vand.u32 4294901760, %v1377_v40  ;;  %v111_v50 = vand.u32 4294901760, %v1379_v41 }
  0x1d   :  { %1145 = vmatpush3.bf16.msra.mxu0 %v1360_v28  ;;  %1073 = vmatpush3.bf16.msra.mxu1 %v1360_v28  ;;  %v159_v51 = vand.u32 4294901760, %v1338_v17  ;;  %v1415_v52 = vsub.f32 %v1369_v35, %v105_v47  ;;  %v166_v54 = vand.u32 4294901760, %v1340_v18  ;;  %v173_v55 = vand.u32 4294901760, %v1348_v23 }
  0x1e   :  { %1146 = vmatprep.subr.bf16.mxu0 %v1289_v1  ;;  %1074 = vmatprep.subr.bf16.mxu1 %v1289_v1  ;;  %v1423_v56 = vpack.c.bf16 %v87_v31, %v84_v30  ;;  %v1428_v57 = vsub.f32 %v1377_v40, %v108_v49  ;;  %v1433_v58 = vsub.f32 %v1379_v41, %v111_v50  ;;  %v180_v62 = vand.u32 4294901760, %v1350_v24 }
  0x1f   :  { %v160_v59 = vsub.f32 %v1338_v17, %v159_v51  ;;  %v1438_v60 = vpack.c.bf16 %v166_v54, %v159_v51  ;;  %v167_v61 = vsub.f32 %v1340_v18, %v166_v54  ;;  %v174_v63 = vsub.f32 %v1348_v23, %v173_v55 }
  0x20   :  { %v187_v2 = vand.u32 4294901760, %v1352_v25  ;;  %v194_v3 = vand.u32 4294901760, %v1362_v29  ;;  %v1447_v5 = vpack.c.bf16 %v180_v62, %v173_v55  ;;  %v181_v7 = vsub.f32 %v1350_v24, %v180_v62 }
  0x21   :  { %1148 = vmatpush3.bf16.msra.mxu0 %v1381_v42  ;;  %1076 = vmatpush3.bf16.msra.mxu1 %v1381_v42  ;;  %v161_v0 = vand.u32 4294901760, %v160_v59  ;;  %v168_v4 = vand.u32 4294901760, %v167_v61  ;;  %v175_v6 = vand.u32 4294901760, %v174_v63  ;;  %v201_v11 = vand.u32 4294901760, %v1371_v36 }
  0x22   :  { %1149 = vmatprep.subr.bf16.mxu0 %v1289_v1  ;;  %1077 = vmatprep.subr.bf16.mxu1 %v1289_v1  ;;  %v1450_v8 = vpack.c.bf16 %v194_v3, %v187_v2  ;;  %v188_v9 = vsub.f32 %v1352_v25, %v187_v2  ;;  %v195_v10 = vsub.f32 %v1362_v29, %v194_v3  ;;  %v182_v14 = vand.u32 4294901760, %v181_v7 }
  0x23   :  { %v1457_v12 = vpack.c.bf16 %v93_v33, %v90_v32  ;;  %v1459_v13 = vpack.c.bf16 %v168_v4, %v161_v0  ;;  %v208_v15 = vand.u32 4294901760, %v1373_v37  ;;  %v202_v21 = vsub.f32 %v1371_v36, %v201_v11 }
  0x24   :  { %v189_v19 = vand.u32 4294901760, %v188_v9  ;;  %v196_v20 = vand.u32 4294901760, %v195_v10  ;;  %v1465_v30 = vpack.c.bf16 %v182_v14, %v175_v6  ;;  %v215_v54 = vand.u32 4294901760, %v1384_v43 }
  0x25   :  { %1151 = vmatpush3.bf16.msra.mxu0 %v1423_v56  ;;  %1079 = vmatpush3.bf16.msra.mxu1 %v1423_v56  ;;  %v1467_v31 = vpack.c.bf16 %v208_v15, %v201_v11  ;;  %v209_v32 = vsub.f32 %v1373_v37, %v208_v15  ;;  %v203_v51 = vand.u32 4294901760, %v202_v21  ;;  %v222_v55 = vand.u32 4294901760, %v1387_v44 }
  0x26   :  { %1152 = vmatprep.subr.bf16.mxu0 %v1289_v1  ;;  %1080 = vmatprep.subr.bf16.mxu1 %v1289_v1  ;;  %v1470_v33 = vpack.c.bf16 %v196_v20, %v189_v19  ;;  %v1480_v59 = vpack.c.bf16 %v99_v38, %v96_v34  ;;  %v216_v63 = vsub.f32 %v1384_v43, %v215_v54  ;;  %v229_v22 = vand.u32 4294901760, %v1394_v45 }
  0x27   :  { %v210_v61 = vand.u32 4294901760, %v209_v32  ;;  %v1484_v62 = vpack.c.bf16 %v222_v55, %v215_v54  ;;  %v223_v0 = vsub.f32 %v1387_v44, %v222_v55  ;;  %v236_v26 = vand.u32 4294901760, %v1399_v46 }
  0x28   :  { %v217_v3 = vand.u32 4294901760, %v216_v63  ;;  %v1498_v34 = vpack.c.bf16 %v105_v47, %v102_v39  ;;  %v230_v7 = vsub.f32 %v1394_v45, %v229_v22  ;;  %v243_v11 = vand.u32 4294901760, %v1405_v48 }
  0x29   :  { %1154 = vmatpush3.bf16.msra.mxu0 %v1457_v12  ;;  %1082 = vmatpush3.bf16.msra.mxu1 %v1457_v12  ;;  %v1488_v2 = vpack.c.bf16 %v210_v61, %v203_v51  ;;  %v224_v4 = vand.u32 4294901760, %v223_v0  ;;  %v1504_v6 = vpack.c.bf16 %v236_v26, %v229_v22  ;;  %v237_v9 = vsub.f32 %v1399_v46, %v236_v26 }
  0x2a   :  { %1155 = vmatprep.subr.bf16.mxu0 %v1289_v1  ;;  %1083 = vmatprep.subr.bf16.mxu1 %v1289_v1  ;;  %v231_v10 = vand.u32 4294901760, %v230_v7  ;;  %v250_v27 = vand.u32 4294901760, %v1415_v52  ;;  %v1516_v35 = vpack.c.bf16 %v111_v50, %v108_v49  ;;  %v244_v14 = vsub.f32 %v1405_v48, %v243_v11 }
  0x2b   :  { %v1502_v38 = vpack.c.bf16 %v224_v4, %v217_v3  ;;  %v238_v39 = vand.u32 4294901760, %v237_v9  ;;  %v257_v40 = vand.u32 4294901760, %v1428_v57  ;;  %v264_v41 = vand.u32 4294901760, %v1433_v58 }
  0x2c   :  { %v1520_v47 = vpack.c.bf16 %v250_v27, %v243_v11  ;;  %v251_v15 = vsub.f32 %v1415_v52, %v250_v27  ;;  %v245_v20 = vand.u32 4294901760, %v244_v14  ;;  %v1117_v63 = vpack.c.bf16 %v1340_v18, %v1338_v17  ;;  %v1551_v18 = vld [vmem:[%s1677_s0] sm:$0xff] }
  0x2d   :  { %1157 = vmatpush3.bf16.msra.mxu0 %v1480_v59  ;;  %1085 = vmatpush3.bf16.msra.mxu1 %v1480_v59  ;;  %v1108_v19 = vpack.c.bf16 %v238_v39, %v231_v10  ;;  %v1186_v50 = vpack.c.bf16 %v264_v41, %v257_v40  ;;  %v258_v32 = vsub.f32 %v1428_v57, %v257_v40  ;;  %v57_v10 = vlaneseq }
  0x2e   :  { %1158 = vmatprep.subr.bf16.mxu0 %v1289_v1  ;;  %1086 = vmatprep.subr.bf16.mxu1 %v1289_v1  ;;  %v252_v21 = vand.u32 4294901760, %v251_v15  ;;  %v265_v51 = vsub.f32 %v1433_v58, %v264_v41  ;;  %v1120_v0 = vpack.c.bf16 %v1350_v24, %v1348_v23  ;;  %v1123_v3 = vpack.c.bf16 %v1362_v29, %v1352_v25 }
  0x2f   :  { %v259_v54 = vand.u32 4294901760, %v258_v32  ;;  %v1126_v4 = vpack.c.bf16 %v1373_v37, %v1371_v36  ;;  %v1129_v22 = vpack.c.bf16 %v1387_v44, %v1384_v43  ;;  %v1132_v26 = vpack.c.bf16 %v1399_v46, %v1394_v45 }
  0x30   :  { %v1111_v49 = vpack.c.bf16 %v252_v21, %v245_v20  ;;  %v266_v55 = vand.u32 4294901760, %v265_v51  ;;  %v1135_v7 = vpack.c.bf16 %v1415_v52, %v1405_v48  ;;  %v1138_v17 = vpack.c.bf16 %v1433_v58, %v1428_v57  ;;  %v34_v48 = vld [vmem:[%s1679_s2] sm:$0xff]  ;;  %s1293_s2 = smov [#allocation5]  }
  0x31   :  { %1160 = vmatpush3.bf16.msra.mxu0 %v1498_v34  ;;  %1088 = vmatpush3.bf16.msra.mxu1 %v1498_v34  ;;  %v51_v9 = vmul.f32 %v1551_v18, %v1551_v18  ;;  %v1556_v11 = vand.u32 127, %v57_v10  ;;  %vm718_vm4 = vcmask 7168   ;;  %s743_s6 = sshll.u32 %s1293_s2, 4  ;;  %s744_s6 = int_to_ptr.vmem [resolvable:$true] %s743_s6 }
  0x32   :  { %1161 = vmatprep.subr.bf16.mxu0 %v1289_v1  ;;  %1089 = vmatprep.subr.bf16.mxu1 %v1289_v1  ;;  %v1114_v61 = vpack.c.bf16 %v266_v55, %v259_v54  ;;  %s1259_s8 = scalar_lea.vmem %s744_s6, 128  ;;  %p1264_p9 = scmp.lt.s32.totalorder %s744_s6, %s744_s6 }
  0x33   :  { %vm732_vm6 = vcmp.eq.s32.totalorder %v1556_v11, 0  ;;  %p1260_p8 = scmp.ne.s32.totalorder %s744_s6, %s1259_s8  ;;  %p1265_p10 = scmp.lt.s32.totalorder %s1259_s8, %s1259_s8 }
  0x34   :  { %52 = vadd.xlane.f32.xlu0 %v51_v9 }
  0x35   :  { %1163 = vmatpush3.bf16.msra.mxu0 %v1516_v35  ;;  %1091 = vmatpush3.bf16.msra.mxu1 %v1516_v35  ;;  %p1266_p11 = por %p1265_p10, %p1264_p9 }
  0x36   :  { %1164 = vmatprep.subr.bf16.mxu0 %v1289_v1  ;;  %1092 = vmatprep.subr.bf16.mxu1 %v1289_v1 }
  0x37   :  { %p1267_p12 = pnand %p1266_p11, %p1260_p8 }
  0x94   :  { %v1558_v27 = vpop.permute.xlu0 %60 }
  0x95   :  { %vm62_vm1 = vcmp.eq.s32.totalorder %v1558_v27, %v1556_v11 }
  0x96   :  { %v752_v39 = vsel %vm62_vm1, 1.0, %v1291_v53 }
  0x97   :  { %v1566_v14 = vsub.f32 %v752_v39, %v752_v39 }
  0x99   :  { %v148_v15 = vand.u32 4294901760, %v1566_v14 }
  0x9b   :  { %996 = vmatmul.mubr.f32.vlgmr.msra.gmra.mrb[0].mxu0 %v148_v15  ;;  %v149_v20 = vsub.f32 %v1566_v14, %v148_v15 }
  0x9c   :  { %1166 = vmatpush3.bf16.msra.mxu0 %v1438_v60  ;;  %1030 = vmatprep.mubr.msk.f32.mxu0 %vm1290_vm0, %v1291_v53  ;;  %v1292_v60 = vmov 1.0  }
  0x9d   :  { %1167 = vmatprep.subr.bf16.mxu0 %v1289_v1  ;;  %v150_v21 = vand.u32 4294901760, %v149_v20 }
  0x9f   :  { %891 = vmatmul.mubr.f32.vlgmr.msra.gmra.mrb[0].mxu1 %v150_v21 }
  0xa0   :  { %1094 = vmatpush3.bf16.msra.mxu1 %v1459_v13  ;;  %1169 = vmatpush3.bf16.msra.mxu0 %v1447_v5 }
  0xa1   :  { %1095 = vmatprep.subr.bf16.mxu1 %v1289_v1  ;;  %1170 = vmatprep.subr.bf16.mxu0 %v1289_v1 }
  0xa2   :  { %925 = vmatprep.mubr.msk.f32.mxu1 %vm1290_vm0, %v1291_v53 }
  0xa4   :  { %1097 = vmatpush3.bf16.msra.mxu1 %v1465_v30  ;;  %1172 = vmatpush3.bf16.msra.mxu0 %v1450_v8 }
  0xa5   :  { %1098 = vmatprep.subr.bf16.mxu1 %v1289_v1  ;;  %1173 = vmatprep.subr.bf16.mxu0 %v1289_v1 }
  0xa8   :  { %1100 = vmatpush3.bf16.msra.mxu1 %v1470_v33  ;;  %1175 = vmatpush3.bf16.msra.mxu0 %v1467_v31 }
  0xa9   :  { %1101 = vmatprep.subr.bf16.mxu1 %v1289_v1  ;;  %1176 = vmatprep.subr.bf16.mxu0 %v1289_v1 }
  0xac   :  { %1103 = vmatpush3.bf16.msra.mxu1 %v1488_v2  ;;  %1178 = vmatpush3.bf16.msra.mxu0 %v1484_v62 }
  0xad   :  { %1104 = vmatprep.subr.bf16.mxu1 %v1289_v1  ;;  %1179 = vmatprep.subr.bf16.mxu0 %v1289_v1 }
  0xb0   :  { %1106 = vmatpush3.bf16.msra.mxu1 %v1502_v38  ;;  %1181 = vmatpush3.bf16.msra.mxu0 %v1504_v6 }
  0xb1   :  { %1107 = vmatprep.subr.bf16.mxu1 %v1289_v1  ;;  %1182 = vmatprep.subr.bf16.mxu0 %v1289_v1 }
  0xb4   :  { %1109 = vmatpush3.bf16.msra.mxu1 %v1108_v19  ;;  %1184 = vmatpush3.bf16.msra.mxu0 %v1520_v47 }
  0xb5   :  { %1110 = vmatprep.subr.bf16.mxu1 %v1289_v1  ;;  %1185 = vmatprep.subr.bf16.mxu0 %v1289_v1 }
  0xb8   :  { %1112 = vmatpush3.bf16.msra.mxu1 %v1111_v49  ;;  %1187 = vmatpush3.bf16.msra.mxu0 %v1186_v50 }
  0xb9   :  { %1113 = vmatprep.subr.bf16.mxu1 %v1289_v1  ;;  %1188 = vmatprep.subr.bf16.mxu0 %v1289_v1 }
  0xbb   :  { %1031 = vmatmul.mubr.msk.f32.vlgmr.msra.gmra.mrb[0].mxu0 %vm62_vm1, %v1292_v60 }
  0xbc   :  { %1115 = vmatpush3.bf16.msra.mxu1 %v1114_v61  ;;  %1190 = vmatpush3.bf16.msra.mxu0 %v1336_v16 }
  0xbd   :  { %1116 = vmatprep.subr.bf16.mxu1 %v1289_v1  ;;  %1191 = vmatprep.subr.bf16.mxu0 %v1289_v1 }
  0xbe   :  { %1065 = vmatprep.mubr.msk.f32.mxu0 %vm1290_vm0, %v1291_v53 }
  0xbf   :  { %926 = vmatmul.mubr.msk.f32.vlgmr.msra.gmra.mrb[0].mxu1 %vm62_vm1, %v1292_v60 }
  0xc0   :  { %1118 = vmatpush3.bf16.msra.mxu1 %v1117_v63  ;;  %1193 = vmatpush3.bf16.msra.mxu0 %v1360_v28 }
  0xc1   :  { %1119 = vmatprep.subr.bf16.mxu1 %v1289_v1  ;;  %1194 = vmatprep.subr.bf16.mxu0 %v1289_v1  ;;  %v53_v16 = vpop.xlane.xlu0 %52 }
  0xc2   :  { %960 = vmatprep.mubr.msk.f32.mxu1 %vm1290_vm0, %v1291_v53  ;;  %v54_v23 = vmax.f32 %v53_v16, 1e-24 }
  0xc4   :  { %1121 = vmatpush3.bf16.msra.mxu1 %v1120_v0  ;;  %1196 = vmatpush3.bf16.msra.mxu0 %v1381_v42  ;;  %1233 = vrsqrt.f32 %v54_v23 }
  0xc5   :  { %1122 = vmatprep.subr.bf16.mxu1 %v1289_v1  ;;  %1197 = vmatprep.subr.bf16.mxu0 %v1289_v1 }
  0xc8   :  { %1124 = vmatpush3.bf16.msra.mxu1 %v1123_v3  ;;  %1199 = vmatpush3.bf16.msra.mxu0 %v1423_v56 }
  0xc9   :  { %1125 = vmatprep.subr.bf16.mxu1 %v1289_v1  ;;  %1200 = vmatprep.subr.bf16.mxu0 %v1289_v1 }
  0xcc   :  { %1127 = vmatpush3.bf16.msra.mxu1 %v1126_v4  ;;  %1202 = vmatpush3.bf16.msra.mxu0 %v1457_v12 }
  0xcd   :  { %1128 = vmatprep.subr.bf16.mxu1 %v1289_v1  ;;  %1203 = vmatprep.subr.bf16.mxu0 %v1289_v1 }
  0xce   :  { %v1234_v24 = vpop.eup %1233 }
  0xcf   :  { %v56_v29 = vmul.f32 %v1234_v24, %v1551_v18 }
  0xd0   :  { %1130 = vmatpush3.bf16.msra.mxu1 %v1129_v22  ;;  %1205 = vmatpush3.bf16.msra.mxu0 %v1480_v59  ;;  %v730_v59 = vshrl.u32 %v57_v10, 7 }
  0xd1   :  { %1131 = vmatprep.subr.bf16.mxu1 %v1289_v1  ;;  %1206 = vmatprep.subr.bf16.mxu0 %v1289_v1 }
  0xd2   :  { %vm731_vm5 = vcmp.eq.s32.totalorder %v730_v59, 0 }
  0xd3   :  { %vm733_vm7 = vmand %vm731_vm5, %vm732_vm6 }
  0xd4   :  { %1133 = vmatpush3.bf16.msra.mxu1 %v1132_v26  ;;  %1208 = vmatpush3.bf16.msra.mxu0 %v1498_v34 }
  0xd5   :  { %1134 = vmatprep.subr.bf16.mxu1 %v1289_v1  ;;  %1209 = vmatprep.subr.bf16.mxu0 %v1289_v1 }
  0xd8   :  { %1136 = vmatpush3.bf16.msra.mxu1 %v1135_v7  ;;  %1211 = vmatpush3.bf16.msra.mxu0 %v1516_v35 }
  0xd9   :  { %1137 = vmatprep.subr.bf16.mxu1 %v1289_v1 }
  0xdb   :  { %1066 = vmatmul.mubr.msk.f32.vlgmr.msra.gmra.mrb[0].mxu0 %vm62_vm1, %v1292_v60 }
  0xdc   :  { %1139 = vmatpush3.bf16.msra.mxu1 %v1138_v17 }
  0xdf   :  { %961 = vmatmul.mubr.f32.vlgmr.msra.gmra.mrb[0].mxu1 %v1566_v14 }
 0x1ae   :  { %v702_v25 = vpop.f32.mrb[0].mxu0 }
 0x1af   :  { %v1067_v28 = vpop.f32.mrb[1].mxu0 }
 0x1b2   :  { %v407_v36 = vpop.f32.mrb[0].mxu1 }
 0x1b3   :  { %v1212_v1 = vadd.f32 %v702_v25, %v407_v36  ;;  %v962_v37 = vpop.f32.mrb[1].mxu1 }
 0x1b5   :  { %v706_v42 = vsub.f32 %v56_v29, %v1212_v1 }
 0x1b7   :  { %v707_v43 = vmul.f32 %v706_v42, %v706_v42 }
 0x1b9   :  { %708 = vadd.xlane.f32.xlu1 %v707_v43 }
 0x246   :  { %v709_v44 = vpop.xlane.xlu1 %708 }
 0x247   :  { %1235 = vrsqrt.f32 %v709_v44  ;;  %vm712_vm2 = vcmp.eq.f32.partialorder %v709_v44, inf  ;;  %v715_v52 = vand.u32 2147483648, %v709_v44  ;;  %vm714_vm3 = vcmp.eq.f32.partialorder %v709_v44, 0.0 }
 0x251   :  { %v1236_v45 = vpop.eup %1235 }
 0x252   :  { %v711_v46 = vmul.f32 %v1236_v45, %v709_v44 }
 0x254   :  { %v713_v53 = vsel %vm712_vm2, %v709_v44, %v711_v46 }
 0x255   :  { %v716_v56 = vsel %vm714_vm3, %v715_v52, %v713_v53 }
 0x256   :  { %v717_v57 = vmul.f32 %v716_v56, %v34_v48 }
 0x258   :  { %v719_v58 = vsel %vm718_vm4, %v717_v57, 0.0 }
 0x259   :  { %720 = vadd.xlane.f32.xlu1 %v719_v58 }
 0x2e6   :  { %v721_v5 = vpop.xlane.xlu1 %720 }
 0x2e7   :  { %v722_v8 = vrot.slane %v721_v5, 4 }
 0x2e9   :  { %v723_v12 = vadd.f32 %v722_v8, %v721_v5 }
 0x2eb   :  { %v724_v13 = vrot.slane %v723_v12, 2 }
 0x2ed   :  { %v725_v30 = vadd.f32 %v724_v13, %v723_v12 }
 0x2ef   :  { %v726_v31 = vrot.slane %v725_v30, 1 }
 0x2f1   :  { %v727_v33 = vadd.f32 %v726_v31, %v725_v30 }
 0x2f3   :  { %1221 = vpush %v727_v33 }
 0x324   :  { %s1222_s7 = spop %1221 }
 0x325   :  { %v734_v62 = vstv %s1222_s7 }
 0x326   :  { %v735_v2 = vsel %vm733_vm7, %v734_v62, 0.0 }
 0x327   :  { %736 = vst [vmem:[#allocation5] sm:$0xff] %v735_v2 }
 0x328   :  { %1270 = shalt.err (!%p1267_p12)
}
 0x329   :  { %s1271_s11 = scalar_lea.hbm %s1681_s4, 128 }
 0x32a   :  { %p1272_p13 = scmp.ne.s32.totalorder %s1681_s4, %s1271_s11  ;;  %p1275_p0 = scmp.lt.u32.totalorder %s1271_s11, %s1681_s4 }
 0x32c   :  { %p1277_p1 = pnand %p1275_p0, %p1272_p13 }
 0x32e   :  { %1280 = shalt.err (!%p1277_p1)
}
 0x32f   :  { %746 = dma.vmem_to_hbm [thread:$0]  %s744_s6, 128, %s1681_s4, [#allocation4]  }
 0x330   :  { %1283 = dma.done.wait [#allocation4], 128  }
 0x331   :  { %1284 = vsyncadd [#allocation4], 4294967168 }
 0x332   :  { %750 = vsyncpa [#allocation3], 1 }
 0x333   :  { %751 = vsyncpa [#allocation4], 1 }

</bundles_post_ra>
